<compile_context>
chip_gen: v7x
topology: tpu7x:2x2x1
jax: 0.10.0
libtpu: 0.0.40
codegen_flags: <defaults>
</compile_context>

<pallas_src>
import jax
import jax.numpy as jnp
from jax.experimental import pallas as pl
from jax.experimental.pallas import tpu as pltpu


def _round_up(n, m):
    return ((n + m - 1) // m) * m


def mlp_kernel(xT_ref, w1_ref, b1_ref, w2_ref, b2_ref, o_ref):
    # fc1 in feature-major layout: (H, D_in) @ (D_in, TB) -> (H, TB), batch on lanes.
    h = jnp.dot(w1_ref[...], xT_ref[...], preferred_element_type=jnp.float32)
    h = h + b1_ref[...]                                   # (H, 1) bias, broadcast on lanes
    # fc2 (out_features=1): VPU multiply by the w2 column + cross-sublane (XLU)
    # reduction instead of a width-1 MXU matmul; fold b2 into the epilogue.
    y = jnp.sum(h * w2_ref[...], axis=0, keepdims=True) + b2_ref[...]   # (1, TB)
    # sigmoid -> EUP; lane-dense (1, TB) store.
    o_ref[...] = (jax.nn.sigmoid(y) * 5.0).astype(o_ref.dtype)


def my_module_forward(x, w1, b1, w2, b2, *, block_batch=None):
    """Forward pass of MyModule.

    Shapes follow the PyTorch module exactly:
      x:  (B, input_size)
      w1: (hidden_size, input_size)   b1: (hidden_size,)
      w2: (1, hidden_size)            b2: (1,)
    Returns (B, 1) float32.
    """
    B, d_in = x.shape
    H = w1.shape[0]

    if block_batch is None:
        block_batch = min(512, _round_up(B, 128))
    TB = block_batch
    assert TB % 128 == 0, "batch tile must be a multiple of the 128-wide lane axis"

    B_pad = _round_up(B, TB)
    num_tiles = B_pad // TB

    # Feature-major activations: batch on the lane axis (layout plumbing in XLA).
    xT = jnp.transpose(x).astype(jnp.float32)             # (D_in, B)
    if B_pad != B:
        xT = jnp.pad(xT, ((0, 0), (0, B_pad - B)))         # (D_in, B_pad)

    w1f = w1.astype(jnp.float32)                           # (H, D_in) -- MXU-ready
    b1c = b1.reshape(H, 1).astype(jnp.float32)             # (H, 1)
    w2c = w2.reshape(H, 1).astype(jnp.float32)             # (H, 1) column
    b2c = b2.reshape(1, 1).astype(jnp.float32)             # (1, 1)

    out = pl.pallas_call(
        mlp_kernel,
        out_shape=jax.ShapeDtypeStruct((1, B_pad), jnp.float32),
        grid_spec=pltpu.PrefetchScalarGridSpec(
            num_scalar_prefetch=0,
            grid=(num_tiles,),
            in_specs=[
                pl.BlockSpec((d_in, TB), lambda i: (0, i)),   # x tile (pipelined)
                pl.BlockSpec((H, d_in), lambda i: (0, 0)),    # w1 resident in VMEM
                pl.BlockSpec((H, 1), lambda i: (0, 0)),       # b1 resident
                pl.BlockSpec((H, 1), lambda i: (0, 0)),       # w2 resident
                pl.BlockSpec((1, 1), lambda i: (0, 0)),       # b2 resident
            ],
            out_specs=pl.BlockSpec((1, TB), lambda i: (0, i)),  # lane-dense output tile
        ),
        compiler_params=pltpu.CompilerParams(
            dimension_semantics=("parallel",),   # shard batch tiles across v7x's 2 TCs
        ),
    )(xT, w1f, b1c, w2c, b2c)

    # (1, B_pad) -> (B, 1): drop batch padding, restore row orientation.
    return out[0, :B].reshape(B, 1)


def init_params(key, input_size, hidden_size):
    """Deterministic init mimicking nn.Linear defaults, in PyTorch orientation."""
    k1, k2, k3, k4 = jax.random.split(key, 4)
    lim1 = 1.0 / (input_size ** 0.5)
    lim2 = 1.0 / (hidden_size ** 0.5)
    w1 = jax.random.uniform(k1, (hidden_size, input_size), jnp.float32, -lim1, lim1)
    b1 = jax.random.uniform(k2, (hidden_size,), jnp.float32, -lim1, lim1)
    w2 = jax.random.uniform(k3, (1, hidden_size), jnp.float32, -lim2, lim2)
    b2 = jax.random.uniform(k4, (1,), jnp.float32, -lim2, lim2)
    return w1, b1, w2, b2


def _reference(x, w1, b1, w2, b2):
    return jax.nn.sigmoid((x @ w1.T + b1) @ w2.T + b2) * 5.0


if __name__ == "__main__":
    input_size = 32
    hidden_size = 16

    key = jax.random.PRNGKey(0)
    k_x, k_x2, k_p = jax.random.split(key, 3)
    w1, b1, w2, b2 = init_params(k_p, input_size, hidden_size)

    # Small-batch case (B=8 -> padded to one 128-wide lane tile, grid=(1,)).
    x_small = jax.random.normal(k_x, (8, input_size), jnp.float32)
    out_small = jax.block_until_ready(my_module_forward(x_small, w1, b1, w2, b2))
    ref_small = _reference(x_small, w1, b1, w2, b2)
    assert out_small.shape == (8, 1)
    assert jnp.allclose(out_small, ref_small, atol=1e-4, rtol=1e-4), float(
        jnp.max(jnp.abs(out_small - ref_small)))

    # Multi-tile case (B=300, TB=128 -> B_pad=384, grid=(3,)): exercises
    # tiling, padding, and the pipelined / parallel batch axis.
    x_big = jax.random.normal(k_x2, (300, input_size), jnp.float32)
    out_big = jax.block_until_ready(
        my_module_forward(x_big, w1, b1, w2, b2, block_batch=128))
    ref_big = _reference(x_big, w1, b1, w2, b2)
    assert out_big.shape == (300, 1)
    assert jnp.allclose(out_big, ref_big, atol=1e-4, rtol=1e-4), float(
        jnp.max(jnp.abs(out_big - ref_big)))

    print("KERNEL_OK")
</pallas_src>

<mosaic_0001>
module attributes {stable_mosaic.version = 11 : i64} {
  func.func @mlp_kernel(%arg0: i32, %arg1: memref<32x128xf32, #tpu.memory_space<vmem>>, %arg2: memref<16x32xf32, #tpu.memory_space<vmem>>, %arg3: memref<16x1xf32, #tpu.memory_space<vmem>>, %arg4: memref<16x1xf32, #tpu.memory_space<vmem>>, %arg5: memref<1x1xf32, #tpu.memory_space<vmem>>, %arg6: memref<1x128xf32, #tpu.memory_space<vmem>>) attributes {dimension_semantics = [#tpu.dimension_semantics<parallel>], iteration_bounds = array<i64: 1>, scalar_prefetch = 0 : i64, scratch_operands = 0 : i64, tpu.core_type = #tpu.core_type<tc>, window_params = [{transform_indices = @transform_0, window_bounds = array<i64: 32, 128>}, {pipeline_mode = #tpu.pipeline_mode<synchronous>, transform_indices = @transform_1, window_bounds = array<i64: 16, 32>}, {pipeline_mode = #tpu.pipeline_mode<synchronous>, transform_indices = @transform_2, window_bounds = array<i64: 16, 1>}, {pipeline_mode = #tpu.pipeline_mode<synchronous>, transform_indices = @transform_3, window_bounds = array<i64: 16, 1>}, {pipeline_mode = #tpu.pipeline_mode<synchronous>, transform_indices = @transform_4, window_bounds = array<i64: 1, 1>}, {transform_indices = @transform_5, window_bounds = array<i64: 1, 128>}]} {
    %c0 = arith.constant 0 : index
    %c0_0 = arith.constant 0 : index
    %0 = vector.load %arg2[%c0, %c0_0] : memref<16x32xf32, #tpu.memory_space<vmem>>, vector<16x32xf32>
    %c0_1 = arith.constant 0 : index
    %c0_2 = arith.constant 0 : index
    %1 = vector.load %arg1[%c0_1, %c0_2] : memref<32x128xf32, #tpu.memory_space<vmem>>, vector<32x128xf32>
    %cst = arith.constant dense<0.000000e+00> : vector<16x128xf32>
    %2 = tpu.matmul %0, %1, %cst {dimension_numbers = #tpu.dot_dimension_numbers<[1], [0], [0], [1], [0, 0, 1, 1], [], []>} : vector<16x32xf32>, vector<32x128xf32>, vector<16x128xf32> -> vector<16x128xf32>
    %c0_3 = arith.constant 0 : index
    %c0_4 = arith.constant 0 : index
    %3 = vector.load %arg3[%c0_3, %c0_4] : memref<16x1xf32, #tpu.memory_space<vmem>>, vector<16x1xf32>
    %4 = vector.broadcast %3 : vector<16x1xf32> to vector<16x128xf32>
    %5 = arith.addf %2, %4 : vector<16x128xf32>
    %c0_5 = arith.constant 0 : index
    %c0_6 = arith.constant 0 : index
    %6 = vector.load %arg4[%c0_5, %c0_6] : memref<16x1xf32, #tpu.memory_space<vmem>>, vector<16x1xf32>
    %7 = vector.broadcast %6 : vector<16x1xf32> to vector<16x128xf32>
    %8 = arith.mulf %5, %7 : vector<16x128xf32>
    %cst_7 = arith.constant dense<0.000000e+00> : vector<128xf32>
    %9 = vector.multi_reduction <add>, %8, %cst_7 [0] : vector<16x128xf32> to vector<128xf32>
    %10 = vector.shape_cast %9 : vector<128xf32> to vector<1x128xf32>
    %c0_8 = arith.constant 0 : index
    %c0_9 = arith.constant 0 : index
    %11 = vector.load %arg5[%c0_8, %c0_9] : memref<1x1xf32, #tpu.memory_space<vmem>>, vector<1x1xf32>
    %12 = vector.broadcast %11 : vector<1x1xf32> to vector<1x128xf32>
    %13 = arith.addf %10, %12 : vector<1x128xf32>
    %14 = arith.negf %13 : vector<1x128xf32>
    %15 = math.exp %14 : vector<1x128xf32>
    %cst_10 = arith.constant 1.000000e+00 : f32
    %16 = vector.broadcast %cst_10 : f32 to vector<1x128xf32>
    %17 = arith.addf %16, %15 : vector<1x128xf32>
    %18 = arith.divf %16, %17 : vector<1x128xf32>
    %cst_11 = arith.constant 5.000000e+00 : f32
    %19 = vector.broadcast %cst_11 : f32 to vector<1x128xf32>
    %20 = arith.mulf %18, %19 : vector<1x128xf32>
    %c0_12 = arith.constant 0 : index
    %c0_13 = arith.constant 0 : index
    %21 = vector.load %arg6[%c0_12, %c0_13] : memref<1x128xf32, #tpu.memory_space<vmem>>, vector<1x128xf32>
    tpu.vector_store %arg6[%c0_12, %c0_13], %20 {strides = array<i32>} : memref<1x128xf32, #tpu.memory_space<vmem>>, vector<1x128xf32>,
    return
  }
  func.func @transform_0(%arg0: i32) -> (i32, i32) {
    %c0_i32 = arith.constant 0 : i32
    %c0_i32_0 = arith.constant 0 : i32
    return %c0_i32, %arg0 : i32, i32
  }
  func.func @transform_1(%arg0: i32) -> (i32, i32) {
    %c0_i32 = arith.constant 0 : i32
    %c0_i32_0 = arith.constant 0 : i32
    %c0_i32_1 = arith.constant 0 : i32
    return %c0_i32, %c0_i32_0 : i32, i32
  }
  func.func @transform_2(%arg0: i32) -> (i32, i32) {
    %c0_i32 = arith.constant 0 : i32
    %c0_i32_0 = arith.constant 0 : i32
    %c0_i32_1 = arith.constant 0 : i32
    return %c0_i32, %c0_i32_0 : i32, i32
  }
  func.func @transform_3(%arg0: i32) -> (i32, i32) {
    %c0_i32 = arith.constant 0 : i32
    %c0_i32_0 = arith.constant 0 : i32
    %c0_i32_1 = arith.constant 0 : i32
    return %c0_i32, %c0_i32_0 : i32, i32
  }
  func.func @transform_4(%arg0: i32) -> (i32, i32) {
    %c0_i32 = arith.constant 0 : i32
    %c0_i32_0 = arith.constant 0 : i32
    %c0_i32_1 = arith.constant 0 : i32
    return %c0_i32, %c0_i32_0 : i32, i32
  }
  func.func @transform_5(%arg0: i32) -> (i32, i32) {
    %c0_i32 = arith.constant 0 : i32
    %c0_i32_0 = arith.constant 0 : i32
    return %c0_i32, %arg0 : i32, i32
  }
}

</mosaic_0001>

<bundles_post_ra>
// kernel: tpu_custom_call.1
= control target key start
LH: loop header
LB: loop body
LE: loop exit
PB: predicated region body
PF: predicated region fallthrough
CT: control target
= control target key end

     0   :  { %s367_s0 = inlined_call_operand.vmem [shape: f32[32,128], index: 0, kind: input, shape index: {}]   ;;  %s368_s1 = inlined_call_operand.hbm [shape: f32[16,32], index: 1, kind: input, shape index: {}]   ;;  %s369_s2 = inlined_call_operand.vmem [shape: f32[16,1], index: 2, kind: input, shape index: {}]   ;;  %s370_s3 = inlined_call_operand.vmem [shape: f32[16,1], index: 3, kind: input, shape index: {}]   ;;  %s371_s4 = inlined_call_operand.<no memory space> [shape: f32[1,1], index: 4, kind: input, shape index: {}]   ;;  %s372_s5 = inlined_call_operand.hbm [shape: f32[1,128], index: 5, kind: output, shape index: {}]  }
   0x1   :  { %v10_v0 = vstv %s371_s4 }
   0x2   :  { %11 = vst [vmem:[#allocation2] sm:$0x1] %v10_v0 }
   0x3   :  { %12 = vsyncpa [#allocation4], 0 }
   0x4   :  { %13 = vsyncpa [#allocation5], 0  ;;  %s279_s20 = smov [#allocation3]   ;;  %s231_s24 = scalar_lea.hbm %s368_s1, 256 }
   0x5   :  { %s21_s21 = sshll.u32 %s279_s20, 4  ;;  %p232_p0 = scmp.ne.s32.totalorder %s368_s1, %s231_s24  ;;  %s22_s21 = int_to_ptr.vmem [resolvable:$true] %s21_s21 }
   0x6   :  { %p235_p1 = scmp.lt.u32.totalorder %s231_s24, %s368_s1 }
   0x8   :  { %p237_p2 = pnand %p235_p1, %p232_p0 }
   0xa   :  { %240 = shalt.err (!%p237_p2)
}
   0xb   :  { %s241_s4 = scalar_lea.vmem %s22_s21, 256  ;;  %p246_p4 = scmp.lt.s32.totalorder %s22_s21, %s22_s21 }
   0xc   :  { %p242_p3 = scmp.ne.s32.totalorder %s22_s21, %s241_s4  ;;  %p247_p5 = scmp.lt.s32.totalorder %s241_s4, %s241_s4 }
   0xe   :  { %p248_p6 = por %p247_p5, %p246_p4 }
  0x10   :  { %p249_p7 = pnand %p248_p6, %p242_p3 }
  0x12   :  { %252 = shalt.err (!%p249_p7)
}
  0x13   :  { %s280_s29 = smov 128   ;;  %s281_s30 = smov 8  }
  0x14   :  { %27 = dma.hbm_to_vmem [thread:$0]  %s368_s1, 256, %s22_s21, [#allocation4], %s280_s29, %s280_s29, %s281_s30  }
  0x15   :  { %275 = dma.done.wait [#allocation4], 256  }
  0x16   :  { %276 = vsyncadd [#allocation4], 4294967040  ;;  %v282_v1 = vmov 0   ;;  %vm55_vm0 = vcmask 261120   ;;  %v39_v2 = vld [vmem:[%s367_s0] sm:$0xff]  ;;  %v40_v3 = vld [vmem:[%s367_s0 + $0x8] sm:$0xff]  ;;  %v164_v25 = vlaneseq }
  0x17   :  { %225 = vset.pattern.permute.xlu0 %v282_v1  ;;  %226 = vset.pattern.permute.xlu1 %v282_v1  ;;  %v41_v4 = vld [vmem:[%s367_s0 + $0x10] sm:$0xff]  ;;  %v212_v5 = vpack.c.bf16 %v40_v3, %v39_v2  ;;  %v42_v6 = vld [vmem:[%s367_s0 + $0x18] sm:$0xff]  ;;  %v37_v7 = vld [vmem:[#allocation3] sm:$0xff] }
  0x18   :  { %v216_v8 = vpack.c.bf16 %v42_v6, %v41_v4  ;;  %209 = vmatprep.mubr.msk.f32.mxu0 %vm55_vm0, %v37_v7  ;;  %v43_v9 = vld [vmem:[%s369_s2] sm:$0xff]  ;;  %v44_v11 = vld [vmem:[%s369_s2 + $0x8] sm:$0xff]  ;;  %v165_v28 = vshrl.u32 %v164_v25, 7  ;;  %s283_s2 = smov [#allocation6]  }
  0x19   :  { %v137_v10 = vld [vmem:[%s370_s3] sm:$0xff]  ;;  %213 = vmatprep.subr.bf16.mxu0 %v212_v5  ;;  %47 = vperm.xlu0 %225, %v43_v9   ;;  %v138_v12 = vld [vmem:[%s370_s3 + $0x8] sm:$0xff]  ;;  %s183_s3 = sshll.u32 %s283_s2, 4  ;;  %s184_s3 = int_to_ptr.vmem [resolvable:$true] %s183_s3 }
  0x1a   :  { %215 = vmatpush3.bf16.msra.mxu0 %v212_v5  ;;  %141 = vperm.xlu1 %226, %v137_v10   ;;  %v38_v13 = vld [vmem:[#allocation3 + $0x8] sm:$0xff]  ;;  %v158_v14 = vld [vmem:[#allocation2] sm:$0x1]  ;;  %v166_v31 = vsub.s32 0, %v165_v28  ;;  %s253_s22 = scalar_lea.vmem %s184_s3, 16  ;;  %s257_s23 = scalar_lea.vmem %s184_s3, 32 }
  0x1b   :  { %217 = vmatprep.subr.bf16.mxu0 %v216_v8  ;;  %p254_p8 = scmp.ne.s32.totalorder %s184_s3, %s253_s22  ;;  %p258_p9 = scmp.lt.s32.totalorder %s184_s3, %s184_s3 }
  0x1c   :  { %p259_p10 = scmp.lt.s32.totalorder %s257_s23, %s253_s22 }
  0x1d   :  { %52 = vperm.xlu0 %225, %v44_v11  }
  0x1e   :  { %219 = vmatpush3.bf16.msra.mxu0 %v216_v8  ;;  %146 = vperm.xlu1 %226, %v138_v12   ;;  %p260_p11 = por %p259_p10, %p258_p9 }
  0x20   :  { %p261_p12 = pnand %p260_p11, %p254_p8 }
  0x21   :  { %210 = vmatmul.mubr.msk.f32.vlgmr.msra.gmra.mrb[0].mxu0 %vm55_vm0, %v38_v13  ;;  %161 = vperm.xlu0 %225, %v158_v14  }
  0x98   :  { %v48_v15 = vpop.permute.xlu0 %47 }
  0x99   :  { %v142_v16 = vpop.permute.xlu1 %141 }
  0x9c   :  { %v53_v17 = vpop.permute.xlu0 %52 }
  0x9d   :  { %v147_v21 = vpop.permute.xlu1 %146 }
  0xa0   :  { %v162_v33 = vpop.permute.xlu0 %161 }
  0xa1   :  { %v167_v35 = vrot.slane %v162_v33, %v166_v31 }
  0xf4   :  { %v211_v18 = vpop.f32.mrb[0].mxu0 }
  0xf5   :  { %v134_v19 = vadd.f32 %v211_v18, %v53_v17  ;;  %v128_v20 = vpop.f32.mrb[1].mxu0 }
  0xf6   :  { %v129_v22 = vadd.f32 %v128_v20, %v48_v15 }
  0xf7   :  { %v150_v23 = vmul.f32 %v147_v21, %v134_v19 }
  0xf8   :  { %v149_v24 = vmul.f32 %v142_v16, %v129_v22 }
  0xfa   :  { %v151_v26 = vadd.f32 %v150_v23, %v149_v24 }
  0xfc   :  { %v152_v27 = vrot.slane %v151_v26, 4 }
  0xfe   :  { %v153_v29 = vadd.f32 %v152_v27, %v151_v26 }
 0x100   :  { %v154_v30 = vrot.slane %v153_v29, 2 }
 0x102   :  { %v155_v32 = vadd.f32 %v154_v30, %v153_v29 }
 0x104   :  { %v156_v34 = vrot.slane %v155_v32, 1 }
 0x106   :  { %v157_v36 = vadd.f32 %v156_v34, %v155_v32 }
 0x108   :  { %v168_v37 = vadd.f32 %v167_v35, %v157_v36 }
 0x10a   :  { %v194_v38 = vmul.f32 -1.442695, %v168_v37 }
 0x10c   :  { %227 = vpow2.f32 %v194_v38 }
 0x116   :  { %v228_v39 = vpop.eup %227 }
 0x117   :  { %v172_v40 = vadd.f32 1.0, %v228_v39 }
 0x119   :  { %229 = vrcp.f32 %v172_v40 }
 0x123   :  { %v230_v41 = vpop.eup %229 }
 0x124   :  { %v175_v42 = vmul.f32 5.0, %v230_v41 }
 0x126   :  { %176 = vst [vmem:[#allocation6] sm:$0x1] %v175_v42 }
 0x127   :  { %264 = shalt.err (!%p261_p12)
}
 0x128   :  { %s265_s26 = scalar_lea.hbm %s372_s5, 16 }
 0x129   :  { %p266_p13 = scmp.ne.s32.totalorder %s372_s5, %s265_s26  ;;  %p269_p0 = scmp.lt.u32.totalorder %s265_s26, %s372_s5 }
 0x12b   :  { %p271_p1 = pnand %p269_p0, %p266_p13 }
 0x12d   :  { %274 = shalt.err (!%p271_p1)
}
 0x12e   :  { %186 = dma.vmem_to_hbm [thread:$0]  %s184_s3, 16, %s372_s5, [#allocation5]  }
 0x12f   :  { %277 = dma.done.wait [#allocation5], 16  }
 0x130   :  { %278 = vsyncadd [#allocation5], 4294967280 }
 0x131   :  { %190 = vsyncpa [#allocation4], 1 }
 0x132   :  { %191 = vsyncpa [#allocation5], 1 }

</bundles_post_ra>
